<compile_context>
chip_gen: v6e
topology: v6e:2x2x1
jax: 0.10.0
libtpu: 0.0.40
codegen_flags: <defaults>
</compile_context>

<pallas_src>
import jax
import jax.numpy as jnp
from jax.experimental import pallas as pl
from jax.experimental.pallas import tpu as pltpu

INPUT_SIZE = 17
HIDDEN_SIZE = 16
NUM_CLASSES = 1


def _leaky_relu(x, slope=0.01):
    return jnp.where(x >= 0, x, slope * x)


def net2_kernel(x_ref, w1_ref, b1_ref, w2_ref, b2_ref, w3_ref, b3_ref, o_ref):
    # x_ref: (17, TB) bf16   w1: (16, 17)  b1: (16, 1)
    # w2: (8, 16)  b2: (8, 1)   w3: (1, 8)  b3: (1, 1)   o_ref: (1, TB) f32
    xT = x_ref[...].astype(jnp.float32)  # upcast before any compute (v5e-safe)

    # layer 1 + (identity dropout) + LeakyReLU
    h1 = jnp.dot(w1_ref[...], xT, preferred_element_type=jnp.float32) + b1_ref[...]
    h1 = _leaky_relu(h1)  # (16, TB)

    # layer 2 + (identity dropout) + LeakyReLU
    h2 = jnp.dot(w2_ref[...], h1, preferred_element_type=jnp.float32) + b2_ref[...]
    h2 = _leaky_relu(h2)  # (8, TB)

    # layer 3 + (identity dropout) + sigmoid -> lane-dense (1, TB) store
    h3 = jnp.dot(w3_ref[...], h2, preferred_element_type=jnp.float32) + b3_ref[...]
    o_ref[...] = jax.nn.sigmoid(h3).astype(o_ref.dtype)


def net2_forward(x, params, *, tile_batch=512):
    """x: (batch, 17) float32. Returns (batch, 1) float32."""
    w1, b1, w2, b2, w3, b3 = params
    batch = x.shape[0]
    num_tiles = (batch + tile_batch - 1) // tile_batch
    padded = num_tiles * tile_batch

    # Batch on the lane axis, bf16 on the wire; pad tail tile with zeros.
    x_t = x.astype(jnp.bfloat16).T  # (17, batch)
    if padded != batch:
        x_t = jnp.pad(x_t, ((0, 0), (0, padded - batch)))

    flops = 2 * padded * (
        INPUT_SIZE * HIDDEN_SIZE
        + HIDDEN_SIZE * (HIDDEN_SIZE // 2)
        + (HIDDEN_SIZE // 2) * NUM_CLASSES
    )
    weight_bytes = 4 * (w1.size + b1.size + w2.size + b2.size + w3.size + b3.size)
    bytes_accessed = padded * INPUT_SIZE * 2 + padded * NUM_CLASSES * 4 + weight_bytes

    out_t = pl.pallas_call(
        net2_kernel,
        out_shape=jax.ShapeDtypeStruct((NUM_CLASSES, padded), jnp.float32),
        grid_spec=pltpu.PrefetchScalarGridSpec(
            num_scalar_prefetch=0,
            grid=(num_tiles,),
            in_specs=[
                # x^T streams tile-by-tile (auto double-buffered).
                pl.BlockSpec((INPUT_SIZE, tile_batch), lambda i: (0, i)),
                # weights/biases: constant block index -> DMA'd once, VMEM-resident.
                pl.BlockSpec((HIDDEN_SIZE, INPUT_SIZE), lambda i: (0, 0)),
                pl.BlockSpec((HIDDEN_SIZE, 1), lambda i: (0, 0)),
                pl.BlockSpec((HIDDEN_SIZE // 2, HIDDEN_SIZE), lambda i: (0, 0)),
                pl.BlockSpec((HIDDEN_SIZE // 2, 1), lambda i: (0, 0)),
                pl.BlockSpec((NUM_CLASSES, HIDDEN_SIZE // 2), lambda i: (0, 0)),
                pl.BlockSpec((NUM_CLASSES, 1), lambda i: (0, 0)),
            ],
            out_specs=pl.BlockSpec((NUM_CLASSES, tile_batch), lambda i: (0, i)),
        ),
        compiler_params=pltpu.CompilerParams(
            dimension_semantics=("parallel",),  # 2x on v7x megacore
        ),
        cost_estimate=pl.CostEstimate(
            flops=int(flops),
            transcendentals=int(padded),
            bytes_accessed=int(bytes_accessed),
        ),
    )(x_t, w1, b1, w2, b2, w3, b3)

    # (1, padded) -> (batch, 1), dropping padded rows.
    return out_t[:, :batch].T


def init_params(key):
    # Deterministic init mimicking PyTorch Linear's U(-1/sqrt(fan_in), 1/sqrt(fan_in)).
    # Weights kept in the PyTorch [out_features, in_features] layout; biases as columns.
    ks = jax.random.split(key, 6)

    def lin(kw, kb, fan_in, fan_out):
        bound = 1.0 / jnp.sqrt(fan_in)
        w = jax.random.uniform(kw, (fan_out, fan_in), jnp.float32, -bound, bound)
        b = jax.random.uniform(kb, (fan_out, 1), jnp.float32, -bound, bound)
        return w, b

    w1, b1 = lin(ks[0], ks[1], INPUT_SIZE, HIDDEN_SIZE)
    w2, b2 = lin(ks[2], ks[3], HIDDEN_SIZE, HIDDEN_SIZE // 2)
    w3, b3 = lin(ks[4], ks[5], HIDDEN_SIZE // 2, NUM_CLASSES)
    return (w1, b1, w2, b2, w3, b3)


def reference_forward(x, params):
    w1, b1, w2, b2, w3, b3 = params
    h = _leaky_relu(x @ w1.T + b1[:, 0])
    h = _leaky_relu(h @ w2.T + b2[:, 0])
    return jax.nn.sigmoid(h @ w3.T + b3[:, 0])


if __name__ == "__main__":
    key = jax.random.PRNGKey(0)
    k_x, k_p = jax.random.split(key)

    batch = 8
    x = jax.random.normal(k_x, (batch, INPUT_SIZE), jnp.float32)
    params = init_params(k_p)

    out = net2_forward(x, params)
    jax.block_until_ready(out)

    # Reference sees the same bf16-quantized input that the kernel consumes.
    x_q = x.astype(jnp.bfloat16).astype(jnp.float32)
    ref = reference_forward(x_q, params)

    assert out.shape == (batch, NUM_CLASSES)
    assert jnp.allclose(out, ref, atol=1e-5, rtol=1e-5)

    print("KERNEL_OK")
</pallas_src>

<mosaic_0001>
module attributes {stable_mosaic.version = 11 : i64} {
  func.func @net2_kernel(%arg0: i32, %arg1: memref<17x512xbf16, #tpu.memory_space<vmem>>, %arg2: memref<16x17xf32, #tpu.memory_space<vmem>>, %arg3: memref<16x1xf32, #tpu.memory_space<vmem>>, %arg4: memref<8x16xf32, #tpu.memory_space<vmem>>, %arg5: memref<8x1xf32, #tpu.memory_space<vmem>>, %arg6: memref<1x8xf32, #tpu.memory_space<vmem>>, %arg7: memref<1x1xf32, #tpu.memory_space<vmem>>, %arg8: memref<1x512xf32, #tpu.memory_space<vmem>>) attributes {dimension_semantics = [#tpu.dimension_semantics<parallel>], iteration_bounds = array<i64: 1>, scalar_prefetch = 0 : i64, scratch_operands = 0 : i64, tpu.core_type = #tpu.core_type<tc>, window_params = [{transform_indices = @transform_0, window_bounds = array<i64: 17, 512>}, {pipeline_mode = #tpu.pipeline_mode<synchronous>, transform_indices = @transform_1, window_bounds = array<i64: 16, 17>}, {pipeline_mode = #tpu.pipeline_mode<synchronous>, transform_indices = @transform_2, window_bounds = array<i64: 16, 1>}, {pipeline_mode = #tpu.pipeline_mode<synchronous>, transform_indices = @transform_3, window_bounds = array<i64: 8, 16>}, {pipeline_mode = #tpu.pipeline_mode<synchronous>, transform_indices = @transform_4, window_bounds = array<i64: 8, 1>}, {pipeline_mode = #tpu.pipeline_mode<synchronous>, transform_indices = @transform_5, window_bounds = array<i64: 1, 8>}, {pipeline_mode = #tpu.pipeline_mode<synchronous>, transform_indices = @transform_6, window_bounds = array<i64: 1, 1>}, {transform_indices = @transform_7, window_bounds = array<i64: 1, 512>}]} {
    %c0 = arith.constant 0 : index
    %c0_0 = arith.constant 0 : index
    %0 = vector.load %arg1[%c0, %c0_0] : memref<17x512xbf16, #tpu.memory_space<vmem>>, vector<17x512xbf16>
    %1 = arith.extf %0 : vector<17x512xbf16> to vector<17x512xf32>
    %c0_1 = arith.constant 0 : index
    %c0_2 = arith.constant 0 : index
    %2 = vector.load %arg2[%c0_1, %c0_2] : memref<16x17xf32, #tpu.memory_space<vmem>>, vector<16x17xf32>
    %cst = arith.constant dense<0.000000e+00> : vector<16x512xf32>
    %3 = tpu.matmul %2, %1, %cst {dimension_numbers = #tpu.dot_dimension_numbers<[1], [0], [0], [1], [0, 0, 1, 1], [], []>} : vector<16x17xf32>, vector<17x512xf32>, vector<16x512xf32> -> vector<16x512xf32>
    %c0_3 = arith.constant 0 : index
    %c0_4 = arith.constant 0 : index
    %4 = vector.load %arg3[%c0_3, %c0_4] : memref<16x1xf32, #tpu.memory_space<vmem>>, vector<16x1xf32>
    %5 = vector.broadcast %4 : vector<16x1xf32> to vector<16x512xf32>
    %6 = arith.addf %3, %5 : vector<16x512xf32>
    %cst_5 = arith.constant 0.000000e+00 : f32
    %7 = vector.broadcast %cst_5 : f32 to vector<16x512xf32>
    %8 = arith.cmpf oge, %6, %7 : vector<16x512xf32>
    %cst_6 = arith.constant 0.00999999977 : f32
    %9 = vector.broadcast %cst_6 : f32 to vector<16x512xf32>
    %10 = arith.mulf %9, %6 : vector<16x512xf32>
    %11 = arith.select %8, %6, %10 : vector<16x512xi1>, vector<16x512xf32>
    %c0_7 = arith.constant 0 : index
    %c0_8 = arith.constant 0 : index
    %12 = vector.load %arg4[%c0_7, %c0_8] : memref<8x16xf32, #tpu.memory_space<vmem>>, vector<8x16xf32>
    %cst_9 = arith.constant dense<0.000000e+00> : vector<8x512xf32>
    %13 = tpu.matmul %12, %11, %cst_9 {dimension_numbers = #tpu.dot_dimension_numbers<[1], [0], [0], [1], [0, 0, 1, 1], [], []>} : vector<8x16xf32>, vector<16x512xf32>, vector<8x512xf32> -> vector<8x512xf32>
    %c0_10 = arith.constant 0 : index
    %c0_11 = arith.constant 0 : index
    %14 = vector.load %arg5[%c0_10, %c0_11] : memref<8x1xf32, #tpu.memory_space<vmem>>, vector<8x1xf32>
    %15 = vector.broadcast %14 : vector<8x1xf32> to vector<8x512xf32>
    %16 = arith.addf %13, %15 : vector<8x512xf32>
    %cst_12 = arith.constant 0.000000e+00 : f32
    %17 = vector.broadcast %cst_12 : f32 to vector<8x512xf32>
    %18 = arith.cmpf oge, %16, %17 : vector<8x512xf32>
    %cst_13 = arith.constant 0.00999999977 : f32
    %19 = vector.broadcast %cst_13 : f32 to vector<8x512xf32>
    %20 = arith.mulf %19, %16 : vector<8x512xf32>
    %21 = arith.select %18, %16, %20 : vector<8x512xi1>, vector<8x512xf32>
    %c0_14 = arith.constant 0 : index
    %c0_15 = arith.constant 0 : index
    %22 = vector.load %arg6[%c0_14, %c0_15] : memref<1x8xf32, #tpu.memory_space<vmem>>, vector<1x8xf32>
    %cst_16 = arith.constant dense<0.000000e+00> : vector<1x512xf32>
    %23 = tpu.matmul %22, %21, %cst_16 {dimension_numbers = #tpu.dot_dimension_numbers<[1], [0], [0], [1], [0, 0, 1, 1], [], []>} : vector<1x8xf32>, vector<8x512xf32>, vector<1x512xf32> -> vector<1x512xf32>
    %c0_17 = arith.constant 0 : index
    %c0_18 = arith.constant 0 : index
    %24 = vector.load %arg7[%c0_17, %c0_18] : memref<1x1xf32, #tpu.memory_space<vmem>>, vector<1x1xf32>
    %25 = vector.broadcast %24 : vector<1x1xf32> to vector<1x512xf32>
    %26 = arith.addf %23, %25 : vector<1x512xf32>
    %27 = arith.negf %26 : vector<1x512xf32>
    %28 = math.exp %27 : vector<1x512xf32>
    %cst_19 = arith.constant 1.000000e+00 : f32
    %29 = vector.broadcast %cst_19 : f32 to vector<1x512xf32>
    %30 = arith.addf %29, %28 : vector<1x512xf32>
    %31 = arith.divf %29, %30 : vector<1x512xf32>
    %c0_20 = arith.constant 0 : index
    %c0_21 = arith.constant 0 : index
    %32 = vector.load %arg8[%c0_20, %c0_21] : memref<1x512xf32, #tpu.memory_space<vmem>>, vector<1x512xf32>
    tpu.vector_store %arg8[%c0_20, %c0_21], %31 {strides = array<i32>} : memref<1x512xf32, #tpu.memory_space<vmem>>, vector<1x512xf32>,
    return
  }
  func.func @transform_0(%arg0: i32) -> (i32, i32) {
    %c0_i32 = arith.constant 0 : i32
    %c0_i32_0 = arith.constant 0 : i32
    return %c0_i32, %arg0 : i32, i32
  }
  func.func @transform_1(%arg0: i32) -> (i32, i32) {
    %c0_i32 = arith.constant 0 : i32
    %c0_i32_0 = arith.constant 0 : i32
    %c0_i32_1 = arith.constant 0 : i32
    return %c0_i32, %c0_i32_0 : i32, i32
  }
  func.func @transform_2(%arg0: i32) -> (i32, i32) {
    %c0_i32 = arith.constant 0 : i32
    %c0_i32_0 = arith.constant 0 : i32
    %c0_i32_1 = arith.constant 0 : i32
    return %c0_i32, %c0_i32_0 : i32, i32
  }
  func.func @transform_3(%arg0: i32) -> (i32, i32) {
    %c0_i32 = arith.constant 0 : i32
    %c0_i32_0 = arith.constant 0 : i32
    %c0_i32_1 = arith.constant 0 : i32
    return %c0_i32, %c0_i32_0 : i32, i32
  }
  func.func @transform_4(%arg0: i32) -> (i32, i32) {
    %c0_i32 = arith.constant 0 : i32
    %c0_i32_0 = arith.constant 0 : i32
    %c0_i32_1 = arith.constant 0 : i32
    return %c0_i32, %c0_i32_0 : i32, i32
  }
  func.func @transform_5(%arg0: i32) -> (i32, i32) {
    %c0_i32 = arith.constant 0 : i32
    %c0_i32_0 = arith.constant 0 : i32
    %c0_i32_1 = arith.constant 0 : i32
    return %c0_i32, %c0_i32_0 : i32, i32
  }
  func.func @transform_6(%arg0: i32) -> (i32, i32) {
    %c0_i32 = arith.constant 0 : i32
    %c0_i32_0 = arith.constant 0 : i32
    %c0_i32_1 = arith.constant 0 : i32
    return %c0_i32, %c0_i32_0 : i32, i32
  }
  func.func @transform_7(%arg0: i32) -> (i32, i32) {
    %c0_i32 = arith.constant 0 : i32
    %c0_i32_0 = arith.constant 0 : i32
    return %c0_i32, %arg0 : i32, i32
  }
}

</mosaic_0001>

<bundles_post_ra>
// kernel: tpu_custom_call.1
= control target key start
LH: loop header
LB: loop body
LE: loop exit
PB: predicated region body
PF: predicated region fallthrough
CT: control target
= control target key end

     0   :  { %s846_s0 = inlined_call_operand.hbm [shape: bf16[17,512], index: 0, kind: input, shape index: {}]   ;;  %s847_s1 = inlined_call_operand.vmem [shape: f32[16,17], index: 1, kind: input, shape index: {}]   ;;  %s848_s2 = inlined_call_operand.vmem [shape: f32[16,1], index: 2, kind: input, shape index: {}]   ;;  %s849_s3 = inlined_call_operand.vmem [shape: f32[8,16], index: 3, kind: input, shape index: {}]   ;;  %s850_s4 = inlined_call_operand.vmem [shape: f32[8,1], index: 4, kind: input, shape index: {}]   ;;  %s851_s5 = inlined_call_operand.vmem [shape: f32[1,8], index: 5, kind: input, shape index: {}]   ;;  %s852_s6 = inlined_call_operand.<no memory space> [shape: f32[1,1], index: 6, kind: input, shape index: {}]   ;;  %s853_s7 = inlined_call_operand.hbm [shape: f32[1,512], index: 7, kind: output, shape index: {}]  }
   0x1   :  { %v12_v0 = vstv %s852_s6 }
   0x2   :  { %13 = vst [vmem:[#allocation2] sm:$0x1] %v12_v0 }
   0x3   :  { %14 = vsyncpa [#allocation4], 0 }
   0x4   :  { %15 = vsyncpa [#allocation5], 0  ;;  %s753_s26 = smov [#allocation3]  }
   0x5   :  { %s21_s27 = sshll.u32 %s753_s26, 4  ;;  %s22_s27 = int_to_ptr.vmem [resolvable:$true] %s21_s27 }
   0x6   :  { %s717_s28 = scalar_lea.vmem %s22_s27, 768  ;;  %p722_p1 = scmp.lt.s32.totalorder %s22_s27, %s22_s27 }
   0x7   :  { %p718_p0 = scmp.ne.s32.totalorder %s22_s27, %s717_s28  ;;  %p723_p2 = scmp.lt.s32.totalorder %s717_s28, %s717_s28 }
   0x9   :  { %p724_p3 = por %p723_p2, %p722_p1 }
   0xb   :  { %p725_p4 = pnand %p724_p3, %p718_p0 }
   0xd   :  { %728 = shalt.err (!%p725_p4)
}
   0xe   :  { %s754_s29 = smov 256   ;;  %s755_s30 = smov 16  }
   0xf   :  { %27 = dma.hbm_to_vmem [thread:$0]  %s846_s0, 768, %s22_s27, [#allocation4], %s754_s29, %s754_s29, %s755_s30  }
  0x10   :  { %749 = dma.done.wait [#allocation4], 768  }
  0x11   :  { %750 = vsyncadd [#allocation4], 4294966528  ;;  %v756_v1 = vmov 0.0   ;;  %v757_v2 = vmov 0   ;;  %v47_v3 = vld [vmem:[#allocation3 + $0x20] sm:$0x11] }
  0x12   :  { %159 = vmatprep.mubr.f32.mxu0 %v756_v1  ;;  %236 = vmatprep.mubr.f32.mxu1 %v756_v1  ;;  %vm82_vm0 = vcmask 1040384   ;;  %v48_v4 = vld [vmem:[#allocation3 + $0x28] sm:$0x11]  ;;  %v45_v5 = vld [vmem:[#allocation3 + $0x10] sm:$0xff]  ;;  %v57_v6 = vunpack.c.l.bf16 %v47_v3  ;;  %v58_v7 = vunpack.c.h.bf16 %v47_v3  ;;  %v46_v10 = vld [vmem:[#allocation3 + $0x18] sm:$0xff]  ;;  %vm75_vm1 = vcmask 138240  }
  0x13   :  { %691 = vset.pattern.permute.xlu0 %v757_v2  ;;  %692 = vset.pattern.permute.xlu1 %v757_v2  ;;  %v59_v8 = vunpack.c.l.bf16 %v48_v4  ;;  %v60_v9 = vunpack.c.h.bf16 %v48_v4  ;;  %v43_v11 = vld [vmem:[#allocation3] sm:$0xff]  ;;  %v44_v12 = vld [vmem:[#allocation3 + $0x8] sm:$0xff]  ;;  %v54_v13 = vunpack.c.h.bf16 %v45_v5  ;;  %v56_v14 = vunpack.c.h.bf16 %v46_v10  ;;  %v439_v26 = vld [vmem:[#allocation2] sm:$0x1] }
  0x14   :  { %v53_v15 = vunpack.c.l.bf16 %v45_v5  ;;  %v55_v16 = vunpack.c.l.bf16 %v46_v10  ;;  %668 = vmatprep.subr.msk.mxu0 %vm82_vm0, %v58_v7  ;;  %v50_v17 = vunpack.c.h.bf16 %v43_v11  ;;  %v52_v18 = vunpack.c.h.bf16 %v44_v12  ;;  %v61_v21 = vld [vmem:[%s847_s1] sm:$0xff]  ;;  %v64_v22 = vld [vmem:[%s848_s2 + $0x8] sm:$0xff] }
  0x15   :  { %672 = vmatprep.subr.msk.mxu1 %vm82_vm0, %v60_v9  ;;  %669 = vmatpush1.msk.msra.mxu0 %vm82_vm0, %v57_v6  ;;  %v49_v19 = vunpack.c.l.bf16 %v43_v11  ;;  %v51_v20 = vunpack.c.l.bf16 %v44_v12  ;;  %v62_v23 = vld [vmem:[%s847_s1 + $0x8] sm:$0xff]  ;;  %v63_v24 = vld [vmem:[%s848_s2] sm:$0xff]  ;;  %vm280_vm10 = vcmask 130048   ;;  %vm449_vm15 = vcmask 64512  }
  0x16   :  { %673 = vmatpush1.msk.msra.mxu1 %vm82_vm0, %v59_v8  ;;  %123 = vmatprep.subr.mxu0 %v54_v13  ;;  %v274_v25 = vld [vmem:[%s850_s4] sm:$0xff] }
  0x17   :  { %200 = vmatprep.subr.mxu1 %v56_v14  ;;  %124 = vmatpush1.msra.mxu0 %v53_v15  ;;  %v273_v59 = vld [vmem:[%s849_s3] sm:$0xff] }
  0x18   :  { %201 = vmatpush1.msra.mxu1 %v55_v16  ;;  %125 = vmatprep.subr.mxu0 %v50_v17  ;;  %v445_v16 = vlaneseq }
  0x19   :  { %202 = vmatprep.subr.mxu1 %v52_v18  ;;  %126 = vmatpush1.msra.mxu0 %v49_v19 }
  0x1a   :  { %203 = vmatpush1.msra.mxu1 %v51_v20  ;;  %670 = vmatmul.mubr.msk.f32.vlgmr.msra.gmra.mxu0 %vm75_vm1, %v61_v21  ;;  %v446_v17 = vshrl.u32 %v445_v16, 7  ;;  %vm650_vm0 = vcmp.lt.s32.totalorder %v445_v16, 512 }
  0x1b   :  { %674 = vmatmul.mubr.msk.f32.vlgmr.msra.gmra.mxu1 %vm75_vm1, %v61_v21  ;;  %165 = vmatprep.mubr.f32.mxu0 %v756_v1 }
  0x1c   :  { %242 = vmatprep.mubr.f32.mxu1 %v756_v1  ;;  %72 = vperm.xlu0 %691, %v64_v22   ;;  %v447_v18 = vsub.s32 0, %v446_v17 }
  0x1d   :  { %277 = vperm.xlu1 %692, %v274_v25  }
  0x1e   :  { %671 = vmatmul.mubr.msk.f32.gmra.mxu0 %vm75_vm1, %v62_v23 }
  0x1f   :  { %675 = vmatmul.mubr.msk.f32.gmra.mxu1 %vm75_vm1, %v62_v23  ;;  %348 = vmatprep.mubr.f32.mxu0 %v756_v1 }
  0x20   :  { %419 = vmatprep.mubr.f32.mxu1 %v756_v1  ;;  %67 = vperm.xlu0 %691, %v63_v24  }
  0x21   :  { %442 = vperm.xlu1 %692, %v439_v26  }
  0x97   :  { %v73_v27 = vpop.permute.xlu0 %72 }
  0x98   :  { %v278_v62 = vpop.permute.xlu1 %277 }
  0x9b   :  { %v68_v32 = vpop.permute.xlu0 %67 }
  0x9c   :  { %v443_v19 = vpop.permute.xlu1 %442 }
  0x9d   :  { %v448_v20 = vrot.slane %v443_v19, %v447_v18 }
  0xda   :  { %v161_v28 = vpop.f32.mrf.mxu0 }
  0xdb   :  { %v238_v29 = vpop.f32.mrf.mxu1  ;;  %v162_v41 = vadd.f32 %v161_v28, %v68_v32 }
  0xdc   :  { %v163_v30 = vpop.f32.mrf.mxu0  ;;  %v239_v42 = vadd.f32 %v238_v29, %v68_v32 }
  0xdd   :  { %v240_v31 = vpop.f32.mrf.mxu1  ;;  %v164_v33 = vadd.f32 %v163_v30, %v68_v32  ;;  %v257_v51 = vmul.f32 0.01, %v162_v41  ;;  %vm249_vm8 = vcmp.ge.f32.partialorder %v162_v41, 0.0 }
  0xde   :  { %v241_v34 = vadd.f32 %v240_v31, %v68_v32  ;;  %v167_v35 = vpop.f32.mrf.mxu0  ;;  %v259_v52 = vmul.f32 0.01, %v239_v42  ;;  %vm251_vm9 = vcmp.ge.f32.partialorder %v239_v42, 0.0 }
  0xdf   :  { %v244_v36 = vpop.f32.mrf.mxu1  ;;  %v168_v37 = vadd.f32 %v167_v35, %v73_v27  ;;  %v258_v43 = vmul.f32 0.01, %v164_v33  ;;  %vm250_vm6 = vcmp.ge.f32.partialorder %v164_v33, 0.0  ;;  %v265_v60 = vsel %vm249_vm8, %v162_v41, %v257_v51 }
  0xe0   :  { %v245_v38 = vadd.f32 %v244_v36, %v73_v27  ;;  %v169_v39 = vpop.f32.mrf.mxu0  ;;  %v260_v44 = vmul.f32 0.01, %v241_v34  ;;  %vm252_vm7 = vcmp.ge.f32.partialorder %v241_v34, 0.0  ;;  %v267_v61 = vsel %vm251_vm9, %v239_v42, %v259_v52 }
  0xe1   :  { %v246_v40 = vpop.f32.mrf.mxu1  ;;  %v170_v45 = vadd.f32 %v169_v39, %v73_v27  ;;  %vm253_vm2 = vcmp.ge.f32.partialorder %v168_v37, 0.0  ;;  %v261_v47 = vmul.f32 0.01, %v168_v37  ;;  %v266_v57 = vsel %vm250_vm6, %v164_v33, %v258_v43 }
  0xe2   :  { %v247_v46 = vadd.f32 %v246_v40, %v73_v27  ;;  %vm255_vm3 = vcmp.ge.f32.partialorder %v245_v38, 0.0  ;;  %v263_v48 = vmul.f32 0.01, %v245_v38  ;;  %v268_v58 = vsel %vm252_vm7, %v241_v34, %v260_v44 }
  0xe3   :  { %v262_v49 = vmul.f32 0.01, %v170_v45  ;;  %vm254_vm4 = vcmp.ge.f32.partialorder %v170_v45, 0.0  ;;  %v269_v55 = vsel %vm253_vm2, %v168_v37, %v261_v47  ;;  %v758_v41 = vmov 1966171168  }
  0xe4   :  { %v264_v50 = vmul.f32 0.01, %v247_v46  ;;  %vm256_vm5 = vcmp.ge.f32.partialorder %v247_v46, 0.0  ;;  %v271_v56 = vsel %vm255_vm3, %v245_v38, %v263_v48  ;;  %v626_v42 = vunpack.c.l.s4 %v758_v41 }
  0xe5   :  { %v270_v53 = vsel %vm254_vm4, %v170_v45, %v262_v49 }
  0xe6   :  { %v272_v54 = vsel %vm256_vm5, %v247_v46, %v264_v50  ;;  %312 = vmatprep.subr.mxu0 %v270_v53  ;;  %v627_v43 = vunpack.c.0.s8 %v626_v42 }
  0xe7   :  { %383 = vmatprep.subr.mxu1 %v272_v54  ;;  %313 = vmatpush1.msra.mxu0 %v269_v55 }
  0xe8   :  { %384 = vmatpush1.msra.mxu1 %v271_v56  ;;  %314 = vmatprep.subr.mxu0 %v266_v57  ;;  %v630_v46 = vsub.s32 %v627_v43, %v446_v17 }
  0xe9   :  { %385 = vmatprep.subr.mxu1 %v268_v58  ;;  %315 = vmatpush1.msra.mxu0 %v265_v60 }
  0xea   :  { %386 = vmatpush1.msra.mxu1 %v267_v61  ;;  %676 = vmatmul.mubr.msk.f32.vlgmr.msra.gmra.mxu0 %vm280_vm10, %v273_v59 }
  0xeb   :  { %677 = vmatmul.mubr.msk.f32.vlgmr.msra.gmra.mxu1 %vm280_vm10, %v273_v59  ;;  %517 = vmatprep.mubr.f32.mxu0 %v756_v1 }
  0xec   :  { %588 = vmatprep.mubr.f32.mxu1 %v756_v1  ;;  %v438_v1 = vld [vmem:[%s851_s5] sm:$0x1]  ;;  %s759_s5 = smov [#allocation6]  }
  0xed   :  { %s659_s18 = sshll.u32 %s759_s5, 4  ;;  %s660_s18 = int_to_ptr.vmem [resolvable:$true] %s659_s18 }
  0xee   :  { %s729_s19 = scalar_lea.vmem %s660_s18, 64  ;;  %p734_p6 = scmp.lt.s32.totalorder %s660_s18, %s660_s18 }
  0xef   :  { %p730_p5 = scmp.ne.s32.totalorder %s660_s18, %s729_s19  ;;  %p735_p7 = scmp.lt.s32.totalorder %s729_s19, %s729_s19 }
  0xf1   :  { %p736_p8 = por %p735_p7, %p734_p6 }
  0xf3   :  { %p737_p9 = pnand %p736_p8, %p730_p5 }
 0x1aa   :  { %v350_v63 = vpop.f32.mrf.mxu0 }
 0x1ab   :  { %v421_v0 = vpop.f32.mrf.mxu1  ;;  %v351_v2 = vadd.f32 %v350_v63, %v278_v62 }
 0x1ac   :  { %v422_v3 = vadd.f32 %v421_v0, %v278_v62  ;;  %v352_v4 = vpop.f32.mrf.mxu0 }
 0x1ad   :  { %v423_v5 = vpop.f32.mrf.mxu1  ;;  %v353_v6 = vadd.f32 %v352_v4, %v278_v62  ;;  %vm426_vm11 = vcmp.ge.f32.partialorder %v351_v2, 0.0  ;;  %v430_v8 = vmul.f32 0.01, %v351_v2 }
 0x1ae   :  { %v424_v7 = vadd.f32 %v423_v5, %v278_v62  ;;  %vm428_vm12 = vcmp.ge.f32.partialorder %v422_v3, 0.0  ;;  %v432_v9 = vmul.f32 0.01, %v422_v3 }
 0x1af   :  { %v431_v10 = vmul.f32 0.01, %v353_v6  ;;  %vm427_vm13 = vcmp.ge.f32.partialorder %v353_v6, 0.0  ;;  %v434_v14 = vsel %vm426_vm11, %v351_v2, %v430_v8 }
 0x1b0   :  { %v433_v11 = vmul.f32 0.01, %v424_v7  ;;  %vm429_vm14 = vcmp.ge.f32.partialorder %v424_v7, 0.0  ;;  %v436_v15 = vsel %vm428_vm12, %v422_v3, %v432_v9 }
 0x1b1   :  { %v435_v12 = vsel %vm427_vm13, %v353_v6, %v431_v10 }
 0x1b2   :  { %v437_v13 = vsel %vm429_vm14, %v424_v7, %v433_v11  ;;  %483 = vmatprep.subr.mxu0 %v435_v12 }
 0x1b3   :  { %554 = vmatprep.subr.mxu1 %v437_v13  ;;  %484 = vmatpush1.msra.mxu0 %v434_v14 }
 0x1b4   :  { %555 = vmatpush1.msra.mxu1 %v436_v15  ;;  %678 = vmatmul.mubr.msk.f32.vlgmr.msra.gmra.mxu0 %vm449_vm15, %v438_v1 }
 0x1b5   :  { %679 = vmatmul.mubr.msk.f32.vlgmr.msra.gmra.mxu1 %vm449_vm15, %v438_v1 }
 0x274   :  { %v519_v21 = vpop.f32.mrf.mxu0 }
 0x275   :  { %v590_v22 = vpop.f32.mrf.mxu1  ;;  %v520_v23 = vadd.f32 %v519_v21, %v448_v20 }
 0x276   :  { %v591_v24 = vadd.f32 %v590_v22, %v448_v20  ;;  %v521_v25 = vpop.f32.mrf.mxu0 }
 0x277   :  { %v592_v26 = vpop.f32.mrf.mxu1  ;;  %v680_v27 = vmul.f32 -1.442695, %v520_v23  ;;  %v522_v29 = vadd.f32 %v521_v25, %v448_v20 }
 0x278   :  { %v682_v28 = vmul.f32 -1.442695, %v591_v24  ;;  %v593_v30 = vadd.f32 %v592_v26, %v448_v20 }
 0x279   :  { %693 = vpow2.f32 %v680_v27  ;;  %v681_v31 = vmul.f32 -1.442695, %v522_v29 }
 0x27a   :  { %v683_v32 = vmul.f32 -1.442695, %v593_v30  ;;  %695 = vpow2.f32 %v682_v28 }
 0x27b   :  { %697 = vpow2.f32 %v681_v31 }
 0x27c   :  { %699 = vpow2.f32 %v683_v32 }
 0x286   :  { %v694_v33 = vpop.eup %693 }
 0x287   :  { %v696_v34 = vpop.eup %695  ;;  %v607_v35 = vadd.f32 1.0, %v694_v33 }
 0x288   :  { %v698_v36 = vpop.eup %697  ;;  %v609_v37 = vadd.f32 1.0, %v696_v34 }
 0x289   :  { %v700_v38 = vpop.eup %699  ;;  %701 = vrcp.f32 %v607_v35  ;;  %v608_v39 = vadd.f32 1.0, %v698_v36 }
 0x28a   :  { %703 = vrcp.f32 %v609_v37  ;;  %v610_v40 = vadd.f32 1.0, %v700_v38 }
 0x28b   :  { %705 = vrcp.f32 %v608_v39 }
 0x28c   :  { %707 = vrcp.f32 %v610_v40 }
 0x296   :  { %v702_v44 = vpop.eup %701 }
 0x297   :  { %v704_v45 = vpop.eup %703 }
 0x298   :  { %v706_v47 = vpop.eup %705 }
 0x299   :  { %v708_v48 = vpop.eup %707  ;;  %v623_v49 = vcombine.low %v702_v44, %v706_v47 }
 0x29a   :  { %v624_v50 = vcombine.low %v704_v45, %v708_v48 }
 0x29b   :  { %v631_v51 = vrot.slane %v623_v49, %v630_v46 }
 0x29c   :  { %v638_v52 = vrot.slane %v624_v50, %v630_v46 }
 0x29e   :  { %v639_v53 = vcombine.low %v631_v51, %v638_v52 }
 0x2a0   :  { %v646_v54 = vrot.slane %v639_v53, %v630_v46 }
 0x2a2   :  { %652 = vst.msk [vmem:[#allocation6] sm:$0xf] %vm650_vm0, %v646_v54 }
 0x2a3   :  { %740 = shalt.err (!%p737_p9)
}
 0x2a4   :  { %662 = dma.vmem_to_hbm [thread:$0]  %s660_s18, 64, %s853_s7, [#allocation5]  }
 0x2a5   :  { %751 = dma.done.wait [#allocation5], 64  }
 0x2a6   :  { %752 = vsyncadd [#allocation5], 4294967232 }
 0x2a7   :  { %666 = vsyncpa [#allocation4], 1 }
 0x2a8   :  { %667 = vsyncpa [#allocation5], 1 }

</bundles_post_ra>
